<compile_context>
chip_gen: v7x
topology: tpu7x:2x2x1
jax: 0.10.0
libtpu: 0.0.40
codegen_flags: <defaults>
</compile_context>

<pallas_src>
import functools

import jax
import jax.numpy as jnp
from jax.experimental import pallas as pl
from jax.experimental.pallas import tpu as pltpu

# --- constants for quint8 / bits=8 / reduce_range=True ----------------------
OBS_QMIN, OBS_QMAX = 0.0, 127.0   # MinMaxObserver quant range (reduce_range)
MOD_QMIN, MOD_QMAX = 0.0, 128.0   # FakeDynamicQuant.qmin/.qmax = (0, 2**(bits-1))
F32_EPS = float(jnp.finfo(jnp.float32).eps)

LANE = 128
SUB = 8                              # sublanes per f32 vreg
ROW_TILE = 2048                      # (2048, 128) f32 tile = 1 MiB per step
SMALL_FUSED_BYTES = 1 * 1024 * 1024  # single-block fused path for tiny inputs


def _vmem_capacity_bytes():
    """Generation-aware VMEM capacity (128 MiB v5e/v6e, 64 MiB v7x per TC)."""
    try:
        info = pltpu.get_tpu_info()
        cap = getattr(info, "vmem_capacity_bytes", None)
        if cap:
            return int(cap)
    except Exception:
        pass
    return 64 * 1024 * 1024   # conservative default (v7x per-TC VMEM)


# --- shared math (used both inside kernels and in plain JAX) -----------------
def _qparams_from_minmax(mn, mx):
    mn = jnp.minimum(mn, 0.0)
    mx = jnp.maximum(mx, 0.0)
    scale = jnp.maximum((mx - mn) / (OBS_QMAX - OBS_QMIN), F32_EPS)
    zp = jnp.clip(OBS_QMIN - jnp.round(mn / scale), OBS_QMIN, OBS_QMAX)
    return scale, zp


def _fake_quant(x, scale, inv_scale, zp):
    # torch multiplies by 1/scale in fake_quantize_per_tensor_affine; so do we.
    q = jnp.clip(jnp.round(x * inv_scale + zp), MOD_QMIN, MOD_QMAX)
    return (q - zp) * scale


def _masked_tile(x, row_start, rows):
    """Fill rows beyond `rows` with +inf / -inf so they don't affect min/max."""
    rid = jax.lax.broadcasted_iota(jnp.int32, x.shape, 0) + row_start
    valid = rid < rows
    return jnp.where(valid, x, jnp.inf), jnp.where(valid, x, -jnp.inf)


# --- path 1: small fused (whole tensor resident in a single block) -----------
def _fused_kernel(x_ref, o_ref):
    x = x_ref[...]
    scale, zp = _qparams_from_minmax(jnp.min(x), jnp.max(x))
    o_ref[...] = _fake_quant(x, scale, 1.0 / scale, zp)


def _fused_call(x2):
    rows = x2.shape[0]
    return pl.pallas_call(
        _fused_kernel,
        out_shape=jax.ShapeDtypeStruct((rows, LANE), jnp.float32),
        grid=(1,),
        in_specs=[pl.BlockSpec((rows, LANE), lambda i: (0, 0))],
        out_specs=pl.BlockSpec((rows, LANE), lambda i: (0, 0)),
        compiler_params=pltpu.CompilerParams(
            dimension_semantics=("arbitrary",)),
    )(x2)


# --- path 2: resident 2-phase (mid-size tensors, 1 HBM read + 1 HBM write) ---
def _resident_kernel(x_ref, o_ref, xcopy_ref, vmin_ref, vmax_ref, qp_ref,
                     *, rows, row_tile):
    p = pl.program_id(0)             # 0 = observe + stash, 1 = quantize
    j = pl.program_id(1)             # tile index
    nt = pl.num_programs(1)
    needs_mask = (rows % row_tile) != 0   # static
    t = row_tile // SUB

    @pl.when((p == 0) & (j == 0))
    def _init():
        vmin_ref[...] = jnp.full(vmin_ref.shape, jnp.inf, dtype=vmin_ref.dtype)
        vmax_ref[...] = jnp.full(vmax_ref.shape, -jnp.inf, dtype=vmax_ref.dtype)

    @pl.when(p == 0)
    def _phase0():
        x = x_ref[...]
        off = pl.multiple_of(j * row_tile, row_tile)
        xcopy_ref[pl.ds(off, row_tile), :] = x          # stash resident copy
        if needs_mask:
            xmin, xmax = _masked_tile(x, j * row_tile, rows)
        else:
            xmin = xmax = x
        # leading-axis (VPU) reduce into a vreg-sized accumulator
        vmin_ref[...] = jnp.minimum(vmin_ref[...],
                                    jnp.min(xmin.reshape(t, SUB, LANE), axis=0))
        vmax_ref[...] = jnp.maximum(vmax_ref[...],
                                    jnp.max(xmax.reshape(t, SUB, LANE), axis=0))

    @pl.when((p == 0) & (j == nt - 1))
    def _qparams():
        scale, zp = _qparams_from_minmax(jnp.min(vmin_ref[...]),
                                         jnp.max(vmax_ref[...]))
        qp_ref[0] = scale
        qp_ref[1] = 1.0 / scale
        qp_ref[2] = zp

    @pl.when(p == 1)
    def _phase1():
        off = pl.multiple_of(j * row_tile, row_tile)
        xx = xcopy_ref[pl.ds(off, row_tile), :]
        o_ref[...] = _fake_quant(xx, qp_ref[0], qp_ref[1], qp_ref[2])


def _resident_call(x2, row_tile, vmem_cap):
    rows = x2.shape[0]
    n_tiles = pl.cdiv(rows, row_tile)
    tile_bytes = row_tile * LANE * 4
    copy_bytes = n_tiles * tile_bytes
    vmem_limit = min(vmem_cap * 3 // 4,
                     copy_bytes + 4 * tile_bytes + (16 << 20))
    kern = functools.partial(_resident_kernel, rows=rows, row_tile=row_tile)
    return pl.pallas_call(
        kern,
        out_shape=jax.ShapeDtypeStruct((rows, LANE), jnp.float32),
        grid=(2, n_tiles),
        # phase 0 walks the tiles; phase 1 pins the input block index to 0 so
        # no further input DMA is issued while quantizing from the VMEM copy.
        in_specs=[pl.BlockSpec((row_tile, LANE), lambda p, j: (j * (1 - p), 0))],
        # phase 0 keeps the output block index constant (never written, never
        # flushed); phase 1 walks the tiles and streams the result out once.
        out_specs=pl.BlockSpec((row_tile, LANE), lambda p, j: (j * p, 0)),
        scratch_shapes=[
            pltpu.VMEM((n_tiles * row_tile, LANE), jnp.float32),  # resident copy
            pltpu.VMEM((SUB, LANE), jnp.float32),                 # min accum
            pltpu.VMEM((SUB, LANE), jnp.float32),                 # max accum
            pltpu.SMEM((3,), jnp.float32),                        # scale,1/scale,zp
        ],
        compiler_params=pltpu.CompilerParams(
            dimension_semantics=("arbitrary", "arbitrary"),
            vmem_limit_bytes=int(vmem_limit)),
    )(x2)


# --- path 3: streaming two-pass (large tensors) -------------------------------
def _minmax_partial_kernel(x_ref, omin_ref, omax_ref,
                           *, rows, row_tile, half_tiles):
    c = pl.program_id(0)             # core split ("parallel" -> both TCs on v7x)
    j = pl.program_id(1)             # tile within this core's half
    needs_mask = (2 * half_tiles * row_tile) != rows   # static
    t = row_tile // SUB

    @pl.when(j == 0)
    def _init():
        omin_ref[...] = jnp.full(omin_ref.shape, jnp.inf, dtype=omin_ref.dtype)
        omax_ref[...] = jnp.full(omax_ref.shape, -jnp.inf, dtype=omax_ref.dtype)

    x = x_ref[...]
    if needs_mask:
        # mask uses the *unclamped* linear tile index; fully-OOB steps (odd
        # tile counts) contribute only +inf/-inf and are harmless.
        xmin, xmax = _masked_tile(x, (c * half_tiles + j) * row_tile, rows)
    else:
        xmin = xmax = x
    omin_ref[...] = jnp.minimum(omin_ref[...],
                                jnp.min(xmin.reshape(t, SUB, LANE), axis=0))
    omax_ref[...] = jnp.maximum(omax_ref[...],
                                jnp.max(xmax.reshape(t, SUB, LANE), axis=0))


def _fakequant_kernel(qp_ref, x_ref, o_ref):
    o_ref[...] = _fake_quant(x_ref[...], qp_ref[0], qp_ref[1], qp_ref[2])


def _two_pass_call(x2, row_tile):
    rows = x2.shape[0]
    n_tiles = pl.cdiv(rows, row_tile)
    half_tiles = pl.cdiv(n_tiles, 2)

    def x_map(c, j):
        # clamp so no block is entirely out of bounds when n_tiles is odd
        return (jnp.minimum(c * half_tiles + j, n_tiles - 1), 0)

    kern1 = functools.partial(_minmax_partial_kernel, rows=rows,
                              row_tile=row_tile, half_tiles=half_tiles)

    # pass 1: per-core partial min/max in vreg-sized (8,128) output blocks
    pmin, pmax = pl.pallas_call(
        kern1,
        out_shape=(jax.ShapeDtypeStruct((2 * SUB, LANE), jnp.float32),
                   jax.ShapeDtypeStruct((2 * SUB, LANE), jnp.float32)),
        grid=(2, half_tiles),
        in_specs=[pl.BlockSpec((row_tile, LANE), x_map)],
        out_specs=(pl.BlockSpec((SUB, LANE), lambda c, j: (c, 0)),
                   pl.BlockSpec((SUB, LANE), lambda c, j: (c, 0))),
        compiler_params=pltpu.CompilerParams(
            dimension_semantics=("parallel", "arbitrary")),
    )(x2)

    # combine the two partials + qparams in plain JAX (a few scalar ops)
    scale, zp = _qparams_from_minmax(jnp.min(pmin), jnp.max(pmax))
    qp = jnp.stack([scale, 1.0 / scale, zp]).astype(jnp.float32)

    # pass 2: pure streaming elementwise fake quantization
    return pl.pallas_call(
        _fakequant_kernel,
        out_shape=jax.ShapeDtypeStruct((rows, LANE), jnp.float32),
        grid=(n_tiles,),
        in_specs=[pl.BlockSpec(memory_space=pltpu.SMEM),
                  pl.BlockSpec((row_tile, LANE), lambda i: (i, 0))],
        out_specs=pl.BlockSpec((row_tile, LANE), lambda i: (i, 0)),
        compiler_params=pltpu.CompilerParams(
            dimension_semantics=("parallel",)),
    )(qp, x2)


# --- public wrapper -----------------------------------------------------------
def fake_dynamic_quant(x, *, small_fused_bytes=SMALL_FUSED_BYTES,
                       resident_max_bytes=None, row_tile=ROW_TILE):
    """Per-tensor fake dynamic quantization (quint8, reduce_range, bits=8)."""
    if x.dtype != jnp.float32:
        # torch module is an identity for non-float32 inputs
        return x
    n = x.size
    if n == 0:
        return x   # degenerate input: identity (observer is undefined anyway)

    orig_shape = x.shape
    flat = x.reshape(-1)

    # Only a trailing sub-128 remainder still needs a lane pad (copy); sizes
    # that are a multiple of 128 pay no pad/copy/slice at all -- partial row
    # tiles are masked inside the kernels instead.
    pad = (-n) % LANE
    if pad:
        # pad with an existing element so the min/max observer is unchanged
        flat = jnp.concatenate([flat, jnp.full((pad,), flat[0], flat.dtype)])
    rows = (n + pad) // LANE
    x2 = flat.reshape(rows, LANE)
    nbytes = n * 4

    vmem_cap = _vmem_capacity_bytes()
    if resident_max_bytes is None:
        resident_max_bytes = vmem_cap // 3   # ~42 MiB v5e/v6e, ~21 MiB v7x

    if nbytes <= small_fused_bytes or rows < SUB:
        y2 = _fused_call(x2)
    else:
        # row tile: multiple of 8 sublanes, never wider than the tensor
        rt = min(int(row_tile), (rows // SUB) * SUB)
        rt = max(SUB, (rt // SUB) * SUB)
        if nbytes <= resident_max_bytes:
            y2 = _resident_call(x2, rt, vmem_cap)
        else:
            y2 = _two_pass_call(x2, rt)

    y = y2.reshape(-1)
    if pad:
        y = y[:n]
    return y.reshape(orig_shape)


# --- pure-JAX reference (same math, no Pallas) --------------------------------
def _reference(x):
    scale, zp = _qparams_from_minmax(jnp.min(x), jnp.max(x))
    return _fake_quant(x, scale, 1.0 / scale, zp)


if __name__ == "__main__":
    key = jax.random.PRNGKey(0)
    # NCHW input, as a PyTorch conv activation would be
    x = jax.random.normal(key, (2, 4, 16, 16), dtype=jnp.float32) * 3.0 + 0.5
    y_ref = jax.block_until_ready(_reference(x))

    # 1) small fused path (tensor fits in a single VMEM block)
    y_fused = jax.block_until_ready(fake_dynamic_quant(x))
    assert y_fused.shape == x.shape and y_fused.dtype == jnp.float32
    assert jnp.allclose(y_fused, y_ref, atol=1e-6, rtol=1e-6)

    # 2) resident 2-phase path (forced with tiny tiles so it runs on this input)
    y_res = jax.block_until_ready(
        fake_dynamic_quant(x, small_fused_bytes=0, row_tile=8))
    assert jnp.allclose(y_res, y_ref, atol=1e-6, rtol=1e-6)

    # 3) streaming two-pass path (forced)
    y_stream = jax.block_until_ready(
        fake_dynamic_quant(x, small_fused_bytes=0, resident_max_bytes=0,
                           row_tile=8))
    assert jnp.allclose(y_stream, y_ref, atol=1e-6, rtol=1e-6)

    # 4) partial trailing tiles + odd tile count -> exercises in-kernel masking
    #    and the clamped dual-core index map on both non-fused paths
    x_odd = jax.random.normal(jax.random.PRNGKey(1), (40, 128),
                              dtype=jnp.float32) * 2.0 - 1.0
    y_odd_ref = jax.block_until_ready(_reference(x_odd))
    y_odd_res = jax.block_until_ready(
        fake_dynamic_quant(x_odd, small_fused_bytes=0, row_tile=16))
    y_odd_str = jax.block_until_ready(
        fake_dynamic_quant(x_odd, small_fused_bytes=0, resident_max_bytes=0,
                           row_tile=8))
    assert jnp.allclose(y_odd_res, y_odd_ref, atol=1e-6, rtol=1e-6)
    assert jnp.allclose(y_odd_str, y_odd_ref, atol=1e-6, rtol=1e-6)

    # 5) ragged (non multiple-of-128) size -> lane-pad tail handling
    x_rag = jax.random.normal(jax.random.PRNGKey(2), (3, 5, 7), jnp.float32)
    y_rag = jax.block_until_ready(fake_dynamic_quant(x_rag))
    assert jnp.allclose(y_rag, _reference(x_rag), atol=1e-6, rtol=1e-6)

    print("KERNEL_OK")
</pallas_src>

<mosaic_0001>
module attributes {stable_mosaic.version = 11 : i64} {
  func.func @_fused_kernel(%arg0: i32, %arg1: memref<16x128xf32, #tpu.memory_space<vmem>>, %arg2: memref<16x128xf32, #tpu.memory_space<vmem>>) attributes {dimension_semantics = [#tpu.dimension_semantics<arbitrary>], iteration_bounds = array<i64: 1>, scalar_prefetch = 0 : i64, scratch_operands = 0 : i64, tpu.core_type = #tpu.core_type<tc>, window_params = [{pipeline_mode = #tpu.pipeline_mode<synchronous>, transform_indices = @transform_0, window_bounds = array<i64: 16, 128>}, {pipeline_mode = #tpu.pipeline_mode<synchronous>, transform_indices = @transform_1, window_bounds = array<i64: 16, 128>}]} {
    %c0 = arith.constant 0 : index
    %c0_0 = arith.constant 0 : index
    %0 = vector.load %arg1[%c0, %c0_0] : memref<16x128xf32, #tpu.memory_space<vmem>>, vector<16x128xf32>
    %1 = vector.shape_cast %0 : vector<16x128xf32> to vector<1x16x128xf32>
    %cst = arith.constant dense<0x7F800000> : vector<1xf32>
    %2 = vector.multi_reduction <minimumf>, %1, %cst [1, 2] : vector<1x16x128xf32> to vector<1xf32>
    %3 = vector.shape_cast %2 : vector<1xf32> to vector<1x1x1xf32>
    %4 = vector.extract %3[0, 0, 0] : f32 from vector<1x1x1xf32>
    %5 = vector.shape_cast %0 : vector<16x128xf32> to vector<1x16x128xf32>
    %cst_1 = arith.constant dense<0xFF800000> : vector<1xf32>
    %6 = vector.multi_reduction <maximumf>, %5, %cst_1 [1, 2] : vector<1x16x128xf32> to vector<1xf32>
    %7 = vector.shape_cast %6 : vector<1xf32> to vector<1x1x1xf32>
    %8 = vector.extract %7[0, 0, 0] : f32 from vector<1x1x1xf32>
    %cst_2 = arith.constant 0.000000e+00 : f32
    %9 = arith.minimumf %4, %cst_2 : f32
    %cst_3 = arith.constant 0.000000e+00 : f32
    %10 = arith.maximumf %8, %cst_3 : f32
    %11 = arith.subf %10, %9 : f32
    %cst_4 = arith.constant 1.270000e+02 : f32
    %12 = arith.divf %11, %cst_4 : f32
    %cst_5 = arith.constant 1.1920929E-7 : f32
    %13 = arith.maximumf %12, %cst_5 : f32
    %14 = arith.divf %9, %13 : f32
    %15 = math.roundeven %14 : f32
    %cst_6 = arith.constant 0.000000e+00 : f32
    %16 = arith.subf %cst_6, %15 : f32
    %cst_7 = arith.constant 0.000000e+00 : f32
    %cst_8 = arith.constant 1.270000e+02 : f32
    %17 = arith.maximumf %cst_7, %16 : f32
    %18 = arith.minimumf %cst_8, %17 : f32
    %cst_9 = arith.constant 1.000000e+00 : f32
    %19 = arith.divf %cst_9, %13 : f32
    %20 = vector.broadcast %19 : f32 to vector<16x128xf32>
    %21 = arith.mulf %0, %20 : vector<16x128xf32>
    %22 = vector.broadcast %18 : f32 to vector<16x128xf32>
    %23 = arith.addf %21, %22 : vector<16x128xf32>
    %24 = math.roundeven %23 : vector<16x128xf32>
    %cst_10 = arith.constant 0.000000e+00 : f32
    %cst_11 = arith.constant 1.280000e+02 : f32
    %25 = vector.broadcast %cst_10 : f32 to vector<16x128xf32>
    %26 = arith.maximumf %25, %24 : vector<16x128xf32>
    %27 = vector.broadcast %cst_11 : f32 to vector<16x128xf32>
    %28 = arith.minimumf %27, %26 : vector<16x128xf32>
    %29 = vector.broadcast %18 : f32 to vector<16x128xf32>
    %30 = arith.subf %28, %29 : vector<16x128xf32>
    %31 = vector.broadcast %13 : f32 to vector<16x128xf32>
    %32 = arith.mulf %30, %31 : vector<16x128xf32>
    %c0_12 = arith.constant 0 : index
    %c0_13 = arith.constant 0 : index
    %33 = vector.load %arg2[%c0_12, %c0_13] : memref<16x128xf32, #tpu.memory_space<vmem>>, vector<16x128xf32>
    tpu.vector_store %arg2[%c0_12, %c0_13], %32 {strides = array<i32>} : memref<16x128xf32, #tpu.memory_space<vmem>>, vector<16x128xf32>,
    return
  }
  func.func @transform_0(%arg0: i32) -> (i32, i32) {
    %c0_i32 = arith.constant 0 : i32
    %c0_i32_0 = arith.constant 0 : i32
    %c0_i32_1 = arith.constant 0 : i32
    return %c0_i32, %c0_i32_0 : i32, i32
  }
  func.func @transform_1(%arg0: i32) -> (i32, i32) {
    %c0_i32 = arith.constant 0 : i32
    %c0_i32_0 = arith.constant 0 : i32
    %c0_i32_1 = arith.constant 0 : i32
    return %c0_i32, %c0_i32_0 : i32, i32
  }
}

</mosaic_0001>

<bundles_post_ra>
// kernel: tpu_custom_call.1
= control target key start
LH: loop header
LB: loop body
LE: loop exit
PB: predicated region body
PF: predicated region fallthrough
CT: control target
= control target key end

     0   :  { %6 = vsyncpa [#allocation3], 0  ;;  %s218_s0 = inlined_call_operand.hbm [shape: f32[16,128], index: 0, kind: input, shape index: {}]   ;;  %s219_s1 = inlined_call_operand.hbm [shape: f32[16,128], index: 1, kind: output, shape index: {}]  }
   0x1   :  { %7 = vsyncpa [#allocation4], 0  ;;  %s171_s6 = smov [#allocation2]   ;;  %s123_s10 = scalar_lea.hbm %s218_s0, 256 }
   0x2   :  { %s13_s7 = sshll.u32 %s171_s6, 4  ;;  %p124_p0 = scmp.ne.s32.totalorder %s218_s0, %s123_s10  ;;  %s14_s7 = int_to_ptr.vmem [resolvable:$true] %s13_s7 }
   0x3   :  { %p127_p1 = scmp.lt.u32.totalorder %s123_s10, %s218_s0 }
   0x5   :  { %p129_p2 = pnand %p127_p1, %p124_p0 }
   0x7   :  { %132 = shalt.err (!%p129_p2)
}
   0x8   :  { %s133_s15 = scalar_lea.vmem %s14_s7, 256  ;;  %p138_p4 = scmp.lt.s32.totalorder %s14_s7, %s14_s7 }
   0x9   :  { %p134_p3 = scmp.ne.s32.totalorder %s14_s7, %s133_s15  ;;  %p139_p5 = scmp.lt.s32.totalorder %s133_s15, %s133_s15 }
   0xb   :  { %p140_p6 = por %p139_p5, %p138_p4 }
   0xd   :  { %p141_p7 = pnand %p140_p6, %p134_p3 }
   0xf   :  { %144 = shalt.err (!%p141_p7)
}
  0x10   :  { %s172_s16 = smov 128   ;;  %s173_s17 = smov 8  }
  0x11   :  { %19 = dma.hbm_to_vmem [thread:$0]  %s218_s0, 256, %s14_s7, [#allocation3], %s172_s16, %s172_s16, %s173_s17  }
  0x12   :  { %167 = dma.done.wait [#allocation3], 256  }
  0x13   :  { %168 = vsyncadd [#allocation3], 4294967040  ;;  %v23_v0 = vld [vmem:[#allocation2] sm:$0xff]  ;;  %v24_v1 = vld [vmem:[#allocation2 + $0x8] sm:$0xff]  ;;  %s174_s21 = smov 0.0   ;;  %s175_s26 = smov 1.1920929e-07  }
  0x14   :  { %v25_v2 = vmin.f32 %v23_v0, %v24_v1  ;;  %v35_v3 = vmax.f32 %v23_v0, %v24_v1  ;;  %s176_s9 = smov 127.0   ;;  %s177_s11 = smov [#allocation5]  }
  0x15   :  { %s94_s12 = sshll.u32 %s177_s11, 4  ;;  %s95_s12 = int_to_ptr.vmem [resolvable:$true] %s94_s12 }
  0x16   :  { %26 = vmin.xlane.f32.xlu0 %v25_v2  ;;  %s145_s13 = scalar_lea.vmem %s95_s12, 256  ;;  %p150_p10 = scmp.lt.s32.totalorder %s95_s12, %s95_s12 }
  0x17   :  { %p146_p9 = scmp.ne.s32.totalorder %s95_s12, %s145_s13  ;;  %p151_p11 = scmp.lt.s32.totalorder %s145_s13, %s145_s13 }
  0x19   :  { %p152_p12 = por %p151_p11, %p150_p10 }
  0x1a   :  { %36 = vmax.xlane.f32.xlu0 %v35_v3 }
  0x1b   :  { %p153_p13 = pnand %p152_p12, %p146_p9 }
  0xa3   :  { %v27_v4 = vpop.xlane.xlu0 %26 }
  0xa4   :  { %v28_v5 = vrot.slane %v27_v4, 4 }
  0xa6   :  { %v29_v6 = vmin.f32 %v27_v4, %v28_v5 }
  0xa7   :  { %v37_v7 = vpop.xlane.xlu0 %36 }
  0xa8   :  { %v30_v8 = vrot.slane %v29_v6, 2  ;;  %v38_v9 = vrot.slane %v37_v7, 4 }
  0xaa   :  { %v39_v10 = vmax.f32 %v37_v7, %v38_v9  ;;  %v31_v11 = vmin.f32 %v29_v6, %v30_v8 }
  0xac   :  { %v40_v12 = vrot.slane %v39_v10, 2  ;;  %v32_v13 = vrot.slane %v31_v11, 1 }
  0xae   :  { %v41_v14 = vmax.f32 %v39_v10, %v40_v12  ;;  %v33_v15 = vmin.f32 %v31_v11, %v32_v13 }
  0xb0   :  { %106 = vpush %v33_v15  ;;  %v42_v16 = vrot.slane %v41_v14, 1 }
  0xb2   :  { %v43_v17 = vmax.f32 %v41_v14, %v42_v16 }
  0xb4   :  { %108 = vpush %v43_v17 }
  0xe1   :  { %s107_s0 = spop %106 }
  0xe2   :  { %s45_s22 = smin.f32 %s174_s21, %s107_s0 }
  0xe5   :  { %s109_s20 = spop %108 }
  0xe6   :  { %s46_s23 = smax.f32 %s174_s21, %s109_s20 }
  0xe7   :  { %s47_s24 = ssub.f32 %s46_s23, %s45_s22 }
  0xe9   :  { %s50_s25 = smul.f32 0.007874016, %s47_s24 }
  0xeb   :  { %s51_s27 = smax.f32 %s175_s26, %s50_s25 }
  0xec   :  { %v52_v18 = vstv %s51_s27 }
  0xed   :  { %121 = vrcp.f32 %v52_v18 }
  0xf7   :  { %v122_v19 = vpop.eup %121 }
  0xf8   :  { %110 = vpush %v122_v19 }
 0x129   :  { %s111_s28 = spop %110 }
 0x12a   :  { %s55_s29 = smul.f32 %s111_s28, %s45_s22  ;;  %v70_v20 = vstv %s111_s28 }
 0x12b   :  { %v71_v21 = vmul.f32 %v70_v20, %v23_v0  ;;  %v72_v22 = vmul.f32 %v70_v20, %v24_v1 }
 0x12c   :  { %s56_s30 = scvt.f32.s32 %s55_s29  ;;  %s61_s2 = sand.u32 2147483647, %s55_s29 }
 0x12d   :  { %s59_s4 = sand.u32 2147483648, %s55_s29  ;;  %p62_p8 = scmp.lt.f32.partialorder %s61_s2, 2.1474836e+09 }
 0x12e   :  { %s57_s3 = scvt.s32.f32 %s56_s30 }
 0x130   :  { %s58_s5 = sand.u32 2147483647, %s57_s3 }
 0x131   :  { %s60_s6 = sor.u32 %s59_s4, %s58_s5 }
 0x132   :  { %s221_s6 = smov (!%p62_p8, %s60_s6), %s55_s29 }
 0x133   :  { %s64_s7 = ssub.f32 0.0, %s221_s6 }
 0x135   :  { %s65_s8 = smax.f32 %s174_s21, %s64_s7 }
 0x136   :  { %s66_s10 = smin.f32 %s176_s9, %s65_s8 }
 0x137   :  { %v73_v23 = vstv %s66_s10 }
 0x138   :  { %v74_v24 = vadd.f32 %v73_v23, %v71_v21  ;;  %v75_v25 = vadd.f32 %v73_v23, %v72_v22 }
 0x13a   :  { %v112_v26 = vround.rtne.f32 %v74_v24  ;;  %v113_v27 = vround.rtne.f32 %v75_v25 }
 0x13c   :  { %v78_v28 = vmax.f32 %v112_v26, 0.0  ;;  %v79_v29 = vmax.f32 %v113_v27, 0.0 }
 0x13e   :  { %v80_v30 = vmin.f32 %v78_v28, 128.0  ;;  %v81_v31 = vmin.f32 %v79_v29, 128.0 }
 0x140   :  { %v82_v32 = vsub.f32 %v80_v30, %v73_v23  ;;  %v83_v33 = vsub.f32 %v81_v31, %v73_v23 }
 0x142   :  { %v85_v34 = vmul.f32 %v82_v32, %v52_v18  ;;  %v86_v35 = vmul.f32 %v83_v33, %v52_v18 }
 0x144   :  { %87 = vst [vmem:[#allocation5] sm:$0xff] %v85_v34  ;;  %88 = vst [vmem:[#allocation5 + $0x8] sm:$0xff] %v86_v35 }
 0x145   :  { %156 = shalt.err (!%p153_p13)
}
 0x146   :  { %s157_s18 = scalar_lea.hbm %s219_s1, 256 }
 0x147   :  { %p158_p0 = scmp.ne.s32.totalorder %s219_s1, %s157_s18  ;;  %p161_p1 = scmp.lt.u32.totalorder %s157_s18, %s219_s1 }
 0x149   :  { %p163_p2 = pnand %p161_p1, %p158_p0 }
 0x14b   :  { %166 = shalt.err (!%p163_p2)
}
 0x14c   :  { %100 = dma.vmem_to_hbm [thread:$0]  %s95_s12, 256, %s219_s1, [#allocation4], %s172_s16, %s172_s16, %s173_s17  }
 0x14d   :  { %169 = dma.done.wait [#allocation4], 256  }
 0x14e   :  { %170 = vsyncadd [#allocation4], 4294967040 }
 0x14f   :  { %104 = vsyncpa [#allocation3], 1 }
 0x150   :  { %105 = vsyncpa [#allocation4], 1 }

</bundles_post_ra>
